<compile_context>
chip_gen: v7x
topology: tpu7x:2x2x1
jax: 0.10.0
libtpu: 0.0.40
codegen_flags: <defaults>
</compile_context>

<pallas_src>
import functools

import jax
import jax.numpy as jnp
from jax.experimental import pallas as pl
from jax.experimental.pallas import tpu as pltpu

KERNEL_SIZE = 61
PAD = KERNEL_SIZE // 2        # 30
LANES = 128                   # TPU lane width


def _ceil_to(v, m):
    return ((v + m - 1) // m) * m


def _build_band(weight):
    """(256, 128) banded Toeplitz: band[p, c] = w[p - c] for 0 <= p-c < 61."""
    w_taps = weight.reshape(KERNEL_SIZE).astype(jnp.float32)          # (61,)
    p = jnp.arange(2 * LANES)[:, None]                                # (256, 1)
    c = jnp.arange(LANES)[None, :]                                    # (1, 128)
    d = p - c
    band = jnp.where((d >= 0) & (d < KERNEL_SIZE),
                     w_taps[jnp.clip(d, 0, KERNEL_SIZE - 1)],
                     jnp.float32(0.0))
    return band.astype(jnp.float32)                                   # (256, 128)


def _conv_band_kernel(band_ref, bias_ref, cur_ref, nxt_ref, out_ref, *, n_sub):
    """Banded-Toeplitz 1-D conv on one (tile_n, tile_l) output tile.

    band_ref : VMEM (256, 128) f32   constant bands [W0; W1] (VMEM-resident)
    bias_ref : SMEM (1,)       f32   bias scalar
    cur_ref  : VMEM (tile_n, tile_l) f32   xpad[:, j*tile_l : (j+1)*tile_l]
    nxt_ref  : VMEM (tile_n, 128)    f32   xpad[:, (j+1)*tile_l : +128] (halo)
    out_ref  : VMEM (tile_n, tile_l) f32
    """
    bias = bias_ref[0]                                   # scalar, VPU broadcast

    for s in range(n_sub):                               # small static unroll
        lo = s * LANES
        if s + 1 < n_sub:
            # Contiguous 256-lane slab -> single K=256 MXU matmul.
            acc = jnp.dot(cur_ref[:, lo:lo + 2 * LANES], band_ref[...],
                          precision=jax.lax.Precision.HIGHEST,
                          preferred_element_type=jnp.float32)
        else:
            # Last sub-block: right half comes from the halo block.
            acc = jnp.dot(cur_ref[:, lo:lo + LANES], band_ref[:LANES, :],
                          precision=jax.lax.Precision.HIGHEST,
                          preferred_element_type=jnp.float32)
            acc = acc + jnp.dot(nxt_ref[...], band_ref[LANES:, :],
                                precision=jax.lax.Precision.HIGHEST,
                                preferred_element_type=jnp.float32)
        out_ref[:, lo:lo + LANES] = acc + bias


def first_4_net_forward(x, weight, bias, *, tile_l=1024, max_tile_n=256):
    """Forward pass matching first_4_net.

    x      : (N, 1, L) float32   (PyTorch NCL layout)
    weight : (1, 1, 61) float32  (Conv1d weight, OIK layout)
    bias   : (1,) float32
    returns: (N, 1, L) float32
    """
    N, C, L = x.shape
    assert C == 1, "first_4_net has in_channels=1"
    assert L > PAD, "reflect padding of 30 requires L > 30"

    x2 = x[:, 0, :].astype(jnp.float32)                               # (N, L)

    # ---- tiling choices -------------------------------------------------
    tile_l = max(LANES, min(tile_l, _ceil_to(L, LANES)))              # mult of 128
    n_sub = tile_l // LANES
    l_out = _ceil_to(L, tile_l)                                       # padded out lanes
    grid_l = l_out // tile_l
    l_pad = l_out + LANES                                             # + halo block

    if N <= max_tile_n:
        tile_n, n_use = N, N                                          # full-dim block
    else:
        tile_n = max_tile_n
        n_use = _ceil_to(N, tile_n)
    grid_n = n_use // tile_n

    # ---- single fused pre-pass: reflect pad + alignment/halo zero pad ----
    xpad = jnp.pad(x2, ((0, 0), (PAD, PAD)), mode="reflect")          # (N, L+60)
    xpad = jnp.pad(xpad, ((0, n_use - N), (0, l_pad - (L + 2 * PAD))))  # (n_use, l_pad)

    band = _build_band(weight)                                        # (256, 128)
    bias_s = bias.reshape(1).astype(jnp.float32)                      # (1,) SMEM scalar

    kernel = functools.partial(_conv_band_kernel, n_sub=n_sub)

    out = pl.pallas_call(
        kernel,
        out_shape=jax.ShapeDtypeStruct((n_use, l_out), jnp.float32),
        grid=(grid_n, grid_l),
        in_specs=[
            # constant band: VMEM-resident (constant index_map)
            pl.BlockSpec((2 * LANES, LANES), lambda n, j: (0, 0)),
            # bias scalar in SMEM
            pl.BlockSpec(memory_space=pltpu.MemorySpace.SMEM),
            # current input tile
            pl.BlockSpec((tile_n, tile_l), lambda n, j: (n, j)),
            # 128-lane halo = head of the next tile (block index in 128-units)
            pl.BlockSpec((tile_n, LANES), lambda n, j: (n, (j + 1) * n_sub)),
        ],
        out_specs=pl.BlockSpec((tile_n, tile_l), lambda n, j: (n, j)),
        compiler_params=pltpu.CompilerParams(
            dimension_semantics=("parallel", "parallel"),
            vmem_limit_bytes=32 * 1024 * 1024,
        ),
        cost_estimate=pl.CostEstimate(
            flops=2 * N * L * KERNEL_SIZE,
            transcendentals=0,
            bytes_accessed=4 * (n_use * l_pad + n_use * l_out),
        ),
    )(band, bias_s, xpad, xpad)

    return out[:N, :L][:, None, :]                                    # (N, 1, L)


if __name__ == "__main__":
    key = jax.random.PRNGKey(0)
    k_x, k_w, k_b = jax.random.split(key, 3)

    # Small shapes consistent with the module: batch=2, 1 channel, seq=200
    # (exercises the non-multiple-of-128 lane path and right zero-padding).
    N, L = 2, 200
    x = jax.random.normal(k_x, (N, 1, L), dtype=jnp.float32)

    # Deterministic Conv1d-style init: U(-1/sqrt(fan_in), 1/sqrt(fan_in)),
    # fan_in = in_channels * kernel_size = 61.
    bound = 1.0 / (KERNEL_SIZE ** 0.5)
    weight = jax.random.uniform(k_w, (1, 1, KERNEL_SIZE), jnp.float32,
                                minval=-bound, maxval=bound)
    bias = jax.random.uniform(k_b, (1,), jnp.float32,
                              minval=-bound, maxval=bound)

    fwd = jax.jit(first_4_net_forward)
    out = fwd(x, weight, bias)
    out = jax.block_until_ready(out)

    # Independent reference: reflect pad + lax.conv (cross-correlation, like torch).
    xpad_ref = jnp.pad(x[:, 0, :], ((0, 0), (PAD, PAD)), mode="reflect")[:, None, :]
    ref = jax.lax.conv_general_dilated(
        xpad_ref, weight, window_strides=(1,), padding="VALID",
        dimension_numbers=("NCH", "OIH", "NCH"),
        precision=jax.lax.Precision.HIGHEST) + bias.reshape(1, 1, 1)

    assert out.shape == (N, 1, L)
    max_err = float(jnp.max(jnp.abs(out - ref)))
    assert jnp.allclose(out, ref, atol=1e-4, rtol=1e-4), f"max abs err {max_err}"
    print("KERNEL_OK")
</pallas_src>

<mosaic_0001>
module attributes {stable_mosaic.version = 11 : i64} {
  func.func @_conv_band_kernel(%arg0: i32, %arg1: i32, %arg2: memref<256x128xf32, #tpu.memory_space<vmem>>, %arg3: memref<1xf32, #tpu.memory_space<smem>>, %arg4: memref<2x256xf32, #tpu.memory_space<vmem>>, %arg5: memref<2x128xf32, #tpu.memory_space<vmem>>, %arg6: memref<2x256xf32, #tpu.memory_space<vmem>>) attributes {dimension_semantics = [#tpu.dimension_semantics<parallel>, #tpu.dimension_semantics<parallel>], iteration_bounds = array<i64: 1, 1>, scalar_prefetch = 0 : i64, scratch_operands = 0 : i64, tpu.core_type = #tpu.core_type<tc>, window_params = [{pipeline_mode = #tpu.pipeline_mode<synchronous>, transform_indices = @transform_0, window_bounds = array<i64: 256, 128>}, {transform_indices = @transform_1, window_bounds = array<i64: 1>}, {transform_indices = @transform_2, window_bounds = array<i64: 2, 256>}, {transform_indices = @transform_3, window_bounds = array<i64: 2, 128>}, {transform_indices = @transform_4, window_bounds = array<i64: 2, 256>}]} {
    %c0 = arith.constant 0 : index
    %0 = memref.load %arg3[%c0] : memref<1xf32, #tpu.memory_space<smem>>
    %c0_0 = arith.constant 0 : index
    %c0_1 = arith.constant 0 : index
    %1 = vector.load %arg4[%c0_0, %c0_1] : memref<2x256xf32, #tpu.memory_space<vmem>>, vector<2x256xf32>
    %c0_2 = arith.constant 0 : index
    %c0_3 = arith.constant 0 : index
    %2 = vector.load %arg2[%c0_2, %c0_3] : memref<256x128xf32, #tpu.memory_space<vmem>>, vector<256x128xf32>
    %cst = arith.constant dense<0.000000e+00> : vector<2x128xf32>
    %3 = tpu.matmul %1, %2, %cst {dimension_numbers = #tpu.dot_dimension_numbers<[1], [0], [0], [1], [0, 0, 1, 1], [], []>, precision = #tpu.contract_precision<fp32>} : vector<2x256xf32>, vector<256x128xf32>, vector<2x128xf32> -> vector<2x128xf32>
    %4 = vector.broadcast %0 : f32 to vector<2x128xf32>
    %5 = arith.addf %3, %4 : vector<2x128xf32>
    %c0_4 = arith.constant 0 : index
    %c0_5 = arith.constant 0 : index
    %6 = vector.load %arg6[%c0_4, %c0_5] : memref<2x256xf32, #tpu.memory_space<vmem>>, vector<2x128xf32>
    tpu.vector_store %arg6[%c0_4, %c0_5], %5 {strides = array<i32>} : memref<2x256xf32, #tpu.memory_space<vmem>>, vector<2x128xf32>,
    %c0_6 = arith.constant 0 : index
    %c128 = arith.constant 128 : index
    %7 = vector.load %arg4[%c0_6, %c128] : memref<2x256xf32, #tpu.memory_space<vmem>>, vector<2x128xf32>
    %c0_7 = arith.constant 0 : index
    %c0_8 = arith.constant 0 : index
    %8 = vector.load %arg2[%c0_7, %c0_8] : memref<256x128xf32, #tpu.memory_space<vmem>>, vector<128x128xf32>
    %cst_9 = arith.constant dense<0.000000e+00> : vector<2x128xf32>
    %9 = tpu.matmul %7, %8, %cst_9 {dimension_numbers = #tpu.dot_dimension_numbers<[1], [0], [0], [1], [0, 0, 1, 1], [], []>, precision = #tpu.contract_precision<fp32>} : vector<2x128xf32>, vector<128x128xf32>, vector<2x128xf32> -> vector<2x128xf32>
    %c0_10 = arith.constant 0 : index
    %c0_11 = arith.constant 0 : index
    %10 = vector.load %arg5[%c0_10, %c0_11] : memref<2x128xf32, #tpu.memory_space<vmem>>, vector<2x128xf32>
    %c128_12 = arith.constant 128 : index
    %c0_13 = arith.constant 0 : index
    %11 = vector.load %arg2[%c128_12, %c0_13] : memref<256x128xf32, #tpu.memory_space<vmem>>, vector<128x128xf32>
    %cst_14 = arith.constant dense<0.000000e+00> : vector<2x128xf32>
    %12 = tpu.matmul %10, %11, %cst_14 {dimension_numbers = #tpu.dot_dimension_numbers<[1], [0], [0], [1], [0, 0, 1, 1], [], []>, precision = #tpu.contract_precision<fp32>} : vector<2x128xf32>, vector<128x128xf32>, vector<2x128xf32> -> vector<2x128xf32>
    %13 = arith.addf %9, %12 : vector<2x128xf32>
    %14 = vector.broadcast %0 : f32 to vector<2x128xf32>
    %15 = arith.addf %13, %14 : vector<2x128xf32>
    %c0_15 = arith.constant 0 : index
    %c128_16 = arith.constant 128 : index
    %16 = vector.load %arg6[%c0_15, %c128_16] : memref<2x256xf32, #tpu.memory_space<vmem>>, vector<2x128xf32>
    tpu.vector_store %arg6[%c0_15, %c128_16], %15 {strides = array<i32>} : memref<2x256xf32, #tpu.memory_space<vmem>>, vector<2x128xf32>,
    return
  }
  func.func @transform_0(%arg0: i32, %arg1: i32) -> (i32, i32) {
    %c0_i32 = arith.constant 0 : i32
    %c0_i32_0 = arith.constant 0 : i32
    %c0_i32_1 = arith.constant 0 : i32
    return %c0_i32, %c0_i32_0 : i32, i32
  }
  func.func @transform_1(%arg0: i32, %arg1: i32) -> i32 {
    %c0_i32 = arith.constant 0 : i32
    %c0_i32_0 = arith.constant 0 : i32
    return %c0_i32 : i32
  }
  func.func @transform_2(%arg0: i32, %arg1: i32) -> (i32, i32) {
    %c0_i32 = arith.constant 0 : i32
    return %arg0, %arg1 : i32, i32
  }
  func.func @transform_3(%arg0: i32, %arg1: i32) -> (i32, i32) {
    %c1_i32 = arith.constant 1 : i32
    %0 = arith.addi %arg1, %c1_i32 : i32
    %c2_i32 = arith.constant 2 : i32
    %1 = arith.muli %0, %c2_i32 : i32
    %c0_i32 = arith.constant 0 : i32
    return %arg0, %1 : i32, i32
  }
  func.func @transform_4(%arg0: i32, %arg1: i32) -> (i32, i32) {
    %c0_i32 = arith.constant 0 : i32
    return %arg0, %arg1 : i32, i32
  }
}

</mosaic_0001>

<bundles_post_ra>
// kernel: first_4_net_forward.1
= control target key start
LH: loop header
LB: loop body
LE: loop exit
PB: predicated region body
PF: predicated region fallthrough
CT: control target
= control target key end

     0   :  { %vm3597_vm0 = vmmov 0   ;;  %s4698_s0 = inlined_call_operand.vmem [shape: f32[256,128], index: 0, kind: input, shape index: {}]   ;;  %s4699_s2 = inlined_call_operand.vmem [shape: f32[2,384], index: 2, kind: input, shape index: {}, may-alias: {2,3}]   ;;  %s4700_s3 = inlined_call_operand.vmem [shape: f32[2,384], index: 3, kind: input, shape index: {}, may-alias: {2,3}]   ;;  %s4701_s1 = inlined_call_operand.<no memory space> [shape: f32[1], index: 1, kind: input, shape index: {}]   ;;  %s4702_s4 = inlined_call_operand.vmem [shape: f32[2,256], index: 4, kind: output, shape index: {}]  }
   0x1   :  { %v58_v0 = vld [vmem:[%s4698_s0 + $0x80] sm:$0xff]  ;;  %v59_v1 = vld [vmem:[%s4698_s0 + $0x88] sm:$0xff]  ;;  %v60_v7 = vld [vmem:[%s4698_s0 + $0x90] sm:$0xff] }
   0x2   :  { %v42_v2 = vld [vmem:[%s4698_s0] sm:$0xff]  ;;  %v135_v3 = vand.u32 4294901760, %v58_v0  ;;  %v138_v4 = vand.u32 4294901760, %v59_v1  ;;  %v43_v5 = vld [vmem:[%s4698_s0 + $0x8] sm:$0xff]  ;;  %v61_v8 = vld [vmem:[%s4698_s0 + $0x98] sm:$0xff]  ;;  %v141_v10 = vand.u32 4294901760, %v60_v7 }
   0x3   :  { %v87_v6 = vand.u32 4294901760, %v42_v2  ;;  %v90_v9 = vand.u32 4294901760, %v43_v5  ;;  %v144_v11 = vand.u32 4294901760, %v61_v8  ;;  %v44_v12 = vld [vmem:[%s4698_s0 + $0x10] sm:$0xff]  ;;  %v45_v13 = vld [vmem:[%s4698_s0 + $0x18] sm:$0xff]  ;;  %v62_v18 = vld [vmem:[%s4698_s0 + $0xa0] sm:$0xff] }
   0x4   :  { %v3648_v14 = vpack.c.bf16 %v138_v4, %v135_v3  ;;  %v93_v16 = vand.u32 4294901760, %v44_v12  ;;  %v96_v17 = vand.u32 4294901760, %v45_v13  ;;  %v63_v19 = vld [vmem:[%s4698_s0 + $0xa8] sm:$0xff]  ;;  %v46_v23 = vld [vmem:[%s4698_s0 + $0x20] sm:$0xff]  ;;  %v3671_v25 = vsub.f32 %v60_v7, %v141_v10  ;;  %v64_v36 = vld [vmem:[%s4698_s0 + $0xb0] sm:$0xff] }
   0x5   :  { %v3650_v15 = vsub.f32 %v42_v2, %v87_v6  ;;  %v3658_v20 = vpack.c.bf16 %v90_v9, %v87_v6  ;;  %v3660_v21 = vsub.f32 %v43_v5, %v90_v9  ;;  %v3662_v22 = vpack.c.bf16 %v144_v11, %v141_v10  ;;  %v47_v24 = vld [vmem:[%s4698_s0 + $0x28] sm:$0xff]  ;;  %v65_v40 = vld [vmem:[%s4698_s0 + $0xb8] sm:$0xff]  ;;  %v48_v53 = vld [vmem:[%s4698_s0 + $0x30] sm:$0xff] }
   0x6   :  { %3114 = vmatprep.subr.bf16.mxu0 %v3648_v14  ;;  %v3673_v26 = vsub.f32 %v61_v8, %v144_v11  ;;  %v3675_v27 = vpack.c.bf16 %v96_v17, %v93_v16  ;;  %v147_v28 = vand.u32 4294901760, %v62_v18  ;;  %v150_v29 = vand.u32 4294901760, %v63_v19  ;;  %v49_v54 = vld [vmem:[%s4698_s0 + $0x38] sm:$0xff]  ;;  %v50_v9 = vld [vmem:[%s4698_s0 + $0x40] sm:$0xff] }
   0x7   :  { %3116 = vmatpush3.bf16.msra.mxu0 %v3658_v20  ;;  %v3678_v30 = vsub.f32 %v58_v0, %v135_v3  ;;  %v3680_v31 = vsub.f32 %v59_v1, %v138_v4  ;;  %v99_v32 = vand.u32 4294901760, %v46_v23  ;;  %v102_v33 = vand.u32 4294901760, %v47_v24  ;;  %v66_v3 = vld [vmem:[%s4698_s0 + $0xc0] sm:$0xff]  ;;  %v67_v4 = vld [vmem:[%s4698_s0 + $0xc8] sm:$0xff] }
   0x8   :  { %3118 = vmatprep.subr.bf16.mxu0 %v3662_v22  ;;  %v4716_v34 = vand.u32 4294901760, %v3650_v15  ;;  %v4715_v35 = vand.u32 4294901760, %v3660_v21  ;;  %v3688_v37 = vsub.f32 %v44_v12, %v93_v16  ;;  %v3690_v38 = vpack.c.bf16 %v150_v29, %v147_v28 }
   0x9   :  { %v4720_v39 = vand.u32 4294901760, %v3678_v30  ;;  %v3696_v41 = vsub.f32 %v45_v13, %v96_v17  ;;  %v3698_v42 = vsub.f32 %v62_v18, %v147_v28  ;;  %v4719_v43 = vand.u32 4294901760, %v3680_v31 }
   0xa   :  { %v3701_v44 = vpack.c.bf16 %v102_v33, %v99_v32  ;;  %v202_v46 = vsub.f32 %v3650_v15, %v4716_v34  ;;  %v209_v47 = vsub.f32 %v3660_v21, %v4715_v35  ;;  %v153_v48 = vand.u32 4294901760, %v64_v36 }
   0xb   :  { %3120 = vmatpush3.bf16.msra.mxu0 %v3675_v27  ;;  %v314_v45 = vsub.f32 %v3678_v30, %v4720_v39  ;;  %v321_v49 = vsub.f32 %v3680_v31, %v4719_v43  ;;  %v156_v50 = vand.u32 4294901760, %v65_v40  ;;  %v4713_v51 = vand.u32 4294901760, %v3671_v25 }
   0xc   :  { %3122 = vmatprep.subr.bf16.mxu0 %v3690_v38  ;;  %v4712_v52 = vand.u32 4294901760, %v3673_v26  ;;  %v3725_v55 = vsub.f32 %v63_v19, %v150_v29  ;;  %v203_v57 = vand.u32 4294901760, %v202_v46  ;;  %v210_v58 = vand.u32 4294901760, %v209_v47 }
   0xd   :  { %v315_v56 = vand.u32 4294901760, %v314_v45  ;;  %v322_v59 = vand.u32 4294901760, %v321_v49  ;;  %v3727_v60 = vsub.f32 %v46_v23, %v99_v32  ;;  %v3729_v61 = vpack.c.bf16 %v156_v50, %v153_v48  ;;  %v51_v23 = vld [vmem:[%s4698_s0 + $0x48] sm:$0xff] }
   0xe   :  { %v328_v62 = vsub.f32 %v3671_v25, %v4713_v51  ;;  %v3147_v63 = vpack.c.bf16 %v210_v58, %v203_v57  ;;  %v335_v0 = vsub.f32 %v3673_v26, %v4712_v52  ;;  %v105_v1 = vand.u32 4294901760, %v48_v53 }
   0xf   :  { %3124 = vmatpush3.bf16.msra.mxu0 %v3701_v44  ;;  %v108_v2 = vand.u32 4294901760, %v49_v54  ;;  %v3744_v5 = vpack.c.bf16 %v322_v59, %v315_v56  ;;  %v4710_v7 = vand.u32 4294901760, %v3688_v37  ;;  %v4709_v8 = vand.u32 4294901760, %v3696_v41 }
  0x10   :  { %3126 = vmatprep.subr.bf16.mxu0 %v3729_v61  ;;  %v329_v6 = vand.u32 4294901760, %v328_v62  ;;  %v3752_v10 = vsub.f32 %v47_v24, %v102_v33  ;;  %v3754_v11 = vsub.f32 %v64_v36, %v153_v48  ;;  %v336_v12 = vand.u32 4294901760, %v335_v0  ;;  %v52_v62 = vld [vmem:[%s4698_s0 + $0x50] sm:$0xff] }
  0x11   :  { %4755 = vst [vmem:[#allocation3_spill] sm:$0xff] %v3744_v5  ;;  %v3756_v13 = vpack.c.bf16 %v108_v2, %v105_v1  ;;  %3146 = vmatprep.subr.bf16.mxu1 %v3744_v5  ;;  %v216_v16 = vsub.f32 %v3688_v37, %v4710_v7  ;;  %v223_v17 = vsub.f32 %v3696_v41, %v4709_v8  ;;  %v159_v18 = vand.u32 4294901760, %v66_v3 }
  0x12   :  { %v162_v19 = vand.u32 4294901760, %v67_v4  ;;  %3148 = vmatpush3.bf16.msra.mxu1 %v3147_v63  ;;  %v3768_v24 = vpack.c.bf16 %v336_v12, %v329_v6  ;;  %v4708_v28 = vand.u32 4294901760, %v3698_v42  ;;  %v4705_v29 = vand.u32 4294901760, %v3725_v55 }
  0x13   :  { %3128 = vmatpush3.bf16.msra.mxu0 %v3756_v13  ;;  %v111_v32 = vand.u32 4294901760, %v50_v9  ;;  %v3773_v33 = vsub.f32 %v65_v40, %v156_v50  ;;  %v217_v36 = vand.u32 4294901760, %v216_v16  ;;  %v224_v45 = vand.u32 4294901760, %v223_v17  ;;  %v68_v40 = vld [vmem:[%s4698_s0 + $0xd0] sm:$0xff]  ;;  %v69_v50 = vld [vmem:[%s4698_s0 + $0xd8] sm:$0xff] }
  0x14   :  { %4756 = vst [vmem:[#allocation4_spill] sm:$0xff] %v3768_v24  ;;  %v3775_v46 = vpack.c.bf16 %v162_v19, %v159_v18  ;;  %3150 = vmatprep.subr.bf16.mxu1 %v3768_v24  ;;  %v3778_v47 = vsub.f32 %v48_v53, %v105_v1  ;;  %v342_v48 = vsub.f32 %v3698_v42, %v4708_v28  ;;  %v114_v56 = vand.u32 4294901760, %v51_v23 }
  0x15   :  { %v349_v49 = vsub.f32 %v3725_v55, %v4705_v29  ;;  %v3792_v57 = vsub.f32 %v49_v54, %v108_v2  ;;  %v3151_v53 = vpack.c.bf16 %v224_v45, %v217_v36  ;;  %v4704_v58 = vand.u32 4294901760, %v3727_v60 }
  0x16   :  { %3130 = vmatprep.subr.bf16.mxu0 %v3775_v46  ;;  %v4703_v59 = vand.u32 4294901760, %v3752_v10  ;;  %v3800_v63 = vsub.f32 %v66_v3, %v159_v18  ;;  %v343_v0 = vand.u32 4294901760, %v342_v48  ;;  %v3802_v6 = vpack.c.bf16 %v114_v56, %v111_v32  ;;  %v53_v3 = vld [vmem:[%s4698_s0 + $0x58] sm:$0xff] }
  0x17   :  { %v350_v1 = vand.u32 4294901760, %v349_v49  ;;  %3152 = vmatpush3.bf16.msra.mxu1 %v3151_v53  ;;  %v230_v54 = vsub.f32 %v3727_v60, %v4704_v58  ;;  %v165_v12 = vand.u32 4294901760, %v68_v40  ;;  %v168_v16 = vand.u32 4294901760, %v69_v50 }
  0x18   :  { %v237_v2 = vsub.f32 %v3752_v10, %v4703_v59  ;;  %3132 = vmatpush3.bf16.msra.mxu0 %v3802_v6  ;;  %v4707_v18 = vand.u32 4294901760, %v3754_v11  ;;  %v4706_v36 = vand.u32 4294901760, %v3773_v33  ;;  %v117_v45 = vand.u32 4294901760, %v52_v62 }
  0x19   :  { %v3813_v17 = vpack.c.bf16 %v350_v1, %v343_v0  ;;  %v3818_v48 = vsub.f32 %v67_v4, %v162_v19  ;;  %v231_v49 = vand.u32 4294901760, %v230_v54  ;;  %v3820_v59 = vpack.c.bf16 %v168_v16, %v165_v12  ;;  %v70_v4 = vld [vmem:[%s4698_s0 + $0xe0] sm:$0xff]  ;;  %v71_v19 = vld [vmem:[%s4698_s0 + $0xe8] sm:$0xff] }
  0x1a   :  { %v238_v53 = vand.u32 4294901760, %v237_v2  ;;  %v3823_v58 = vsub.f32 %v50_v9, %v111_v32  ;;  %v356_v0 = vsub.f32 %v3754_v11, %v4707_v18  ;;  %v363_v1 = vsub.f32 %v3773_v33, %v4706_v36  ;;  %v54_v36 = vld [vmem:[%s4698_s0 + $0x60] sm:$0xff] }
  0x1b   :  { %4757 = vst [vmem:[#allocation5_spill] sm:$0xff] %v3813_v17  ;;  %3154 = vmatprep.subr.bf16.mxu1 %v3813_v17  ;;  %v120_v29 = vand.u32 4294901760, %v53_v3  ;;  %v3837_v54 = vsub.f32 %v51_v23, %v114_v56  ;;  %3134 = vmatprep.subr.bf16.mxu0 %v3820_v59  ;;  %v4711_v32 = vand.u32 4294901760, %v3778_v47  ;;  %v4714_v2 = vand.u32 4294901760, %v3792_v57 }
  0x1c   :  { %v3155_v9 = vpack.c.bf16 %v238_v53, %v231_v49  ;;  %v3845_v18 = vsub.f32 %v68_v40, %v165_v12  ;;  %v357_v28 = vand.u32 4294901760, %v356_v0  ;;  %v364_v8 = vand.u32 4294901760, %v363_v1  ;;  %v55_v40 = vld [vmem:[%s4698_s0 + $0x68] sm:$0xff] }
  0x1d   :  { %v3847_v7 = vpack.c.bf16 %v120_v29, %v117_v45  ;;  %v244_v23 = vsub.f32 %v3778_v47, %v4711_v32  ;;  %v251_v56 = vsub.f32 %v3792_v57, %v4714_v2  ;;  %v171_v49 = vand.u32 4294901760, %v70_v4 }
  0x1e   :  { %3156 = vmatpush3.bf16.msra.mxu1 %v3155_v9  ;;  %v174_v53 = vand.u32 4294901760, %v71_v19  ;;  %v3858_v12 = vpack.c.bf16 %v364_v8, %v357_v28  ;;  %v4718_v0 = vand.u32 4294901760, %v3800_v63  ;;  %v4717_v1 = vand.u32 4294901760, %v3818_v48 }
  0x1f   :  { %3136 = vmatpush3.bf16.msra.mxu0 %v3847_v7  ;;  %v123_v9 = vand.u32 4294901760, %v54_v36  ;;  %v3863_v32 = vsub.f32 %v69_v50, %v168_v16  ;;  %v245_v52 = vand.u32 4294901760, %v244_v23  ;;  %v252_v51 = vand.u32 4294901760, %v251_v56  ;;  %v72_v50 = vld [vmem:[%s4698_s0 + $0xf0] sm:$0xff]  ;;  %v73_v16 = vld [vmem:[%s4698_s0 + $0xf8] sm:$0xff] }
  0x20   :  { %4758 = vst [vmem:[#allocation6_spill] sm:$0xff] %v3858_v12  ;;  %v3865_v2 = vpack.c.bf16 %v174_v53, %v171_v49  ;;  %3158 = vmatprep.subr.bf16.mxu1 %v3858_v12  ;;  %v3868_v35 = vsub.f32 %v52_v62, %v117_v45  ;;  %v370_v8 = vsub.f32 %v3800_v63, %v4718_v0  ;;  %v126_v34 = vand.u32 4294901760, %v55_v40 }
  0x21   :  { %v377_v28 = vsub.f32 %v3818_v48, %v4717_v1  ;;  %v3882_v23 = vsub.f32 %v53_v3, %v120_v29  ;;  %v3159_v62 = vpack.c.bf16 %v252_v51, %v245_v52  ;;  %v4722_v45 = vand.u32 4294901760, %v3823_v58  ;;  %v56_v1 = vld [vmem:[%s4698_s0 + $0x70] sm:$0xff] }
  0x22   :  { %4759 = vst [vmem:[#allocation7_spill] sm:$0xff] %v3865_v2  ;;  %3138 = vmatprep.subr.bf16.mxu0 %v3865_v2  ;;  %v4725_v56 = vand.u32 4294901760, %v3837_v54  ;;  %v3890_v0 = vsub.f32 %v70_v4, %v171_v49  ;;  %v371_v43 = vand.u32 4294901760, %v370_v8  ;;  %v3892_v12 = vpack.c.bf16 %v126_v34, %v123_v9  ;;  %v57_v4 = vld [vmem:[%s4698_s0 + $0x78] sm:$0xff] }
  0x23   :  { %v378_v39 = vand.u32 4294901760, %v377_v28  ;;  %3160 = vmatpush3.bf16.msra.mxu1 %v3159_v62  ;;  %v258_v51 = vsub.f32 %v3823_v58, %v4722_v45  ;;  %v177_v29 = vand.u32 4294901760, %v72_v50  ;;  %v180_v3 = vand.u32 4294901760, %v73_v16 }
  0x24   :  { %4760 = vst [vmem:[#allocation8_spill] sm:$0xff] %v3892_v12  ;;  %v265_v52 = vsub.f32 %v3837_v54, %v4725_v56  ;;  %3140 = vmatpush3.bf16.msra.mxu0 %v3892_v12  ;;  %v4729_v8 = vand.u32 4294901760, %v3845_v18  ;;  %v4733_v28 = vand.u32 4294901760, %v3863_v32  ;;  %v129_v62 = vand.u32 4294901760, %v56_v1 }
  0x25   :  { %v3903_v49 = vpack.c.bf16 %v378_v39, %v371_v43  ;;  %v3908_v45 = vsub.f32 %v71_v19, %v174_v53  ;;  %v259_v17 = vand.u32 4294901760, %v258_v51  ;;  %v3910_v56 = vpack.c.bf16 %v180_v3, %v177_v29  ;;  %v2277_v19 = vld.sshfl [vmem:[%s4699_s2] sm:$0x33 pattern:$0x76325410] }
  0x26   :  { %v266_v24 = vand.u32 4294901760, %v265_v52  ;;  %v3913_v5 = vsub.f32 %v54_v36, %v123_v9  ;;  %v384_v39 = vsub.f32 %v3845_v18, %v4729_v8  ;;  %v391_v43 = vsub.f32 %v3863_v32, %v4733_v28 }
  0x27   :  { %4761 = vst [vmem:[#allocation9_spill] sm:$0xff] %v3903_v49  ;;  %4762 = vst [vmem:[#allocation10_spill] sm:$0xff] %v3910_v56  ;;  %3162 = vmatprep.subr.bf16.mxu1 %v3903_v49  ;;  %v132_v12 = vand.u32 4294901760, %v57_v4  ;;  %v3924_v53 = vsub.f32 %v55_v40, %v126_v34  ;;  %3142 = vmatprep.subr.bf16.mxu0 %v3910_v56  ;;  %v4734_v36 = vand.u32 4294901760, %v3868_v35  ;;  %v4735_v9 = vand.u32 4294901760, %v3882_v23 }
  0x28   :  { %v3163_v51 = vpack.c.bf16 %v266_v24, %v259_v17  ;;  %v3929_v52 = vsub.f32 %v72_v50, %v177_v29  ;;  %v385_v8 = vand.u32 4294901760, %v384_v39  ;;  %v392_v49 = vand.u32 4294901760, %v391_v43 }
  0x29   :  { %v3931_v2 = vpack.c.bf16 %v132_v12, %v129_v62  ;;  %v272_v28 = vsub.f32 %v3868_v35, %v4734_v36  ;;  %v279_v34 = vsub.f32 %v3882_v23, %v4735_v9  ;;  %v83_v24 = vcombine.high %v2277_v19, %v2277_v19 }
  0x2a   :  { %3164 = vmatpush3.bf16.msra.mxu1 %v3163_v51  ;;  %v3939_v17 = vand.u32 4294901760, %v2277_v19  ;;  %v3941_v40 = vsub.f32 %v73_v16, %v180_v3  ;;  %v3943_v50 = vpack.c.bf16 %v392_v49, %v385_v8  ;;  %v4736_v29 = vand.u32 4294901760, %v3890_v0 }
  0x2b   :  { %4763 = vst [vmem:[#allocation11_spill] sm:$0xff] %v3931_v2  ;;  %3144 = vmatpush3.bf16.msra.mxu0 %v3931_v2  ;;  %v4740_v39 = vand.u32 4294901760, %v3908_v45  ;;  %v273_v43 = vand.u32 4294901760, %v272_v28  ;;  %v280_v51 = vand.u32 4294901760, %v279_v34  ;;  %v3948_v36 = vand.u32 4294901760, %v83_v24 }
  0x2c   :  { %4764 = vst [vmem:[#allocation12_spill] sm:$0xff] %v3943_v50  ;;  %v3952_v9 = vpack.c.bf16 %v3680_v31, %v3678_v30  ;;  %3166 = vmatprep.subr.bf16.mxu1 %v3943_v50  ;;  %v3955_v16 = vsub.f32 %v56_v1, %v129_v62  ;;  %v398_v3 = vsub.f32 %v3890_v0, %v4736_v29  ;;  %v4742_v1 = vand.u32 4294901760, %v3913_v5 }
  0x2d   :  { %4765 = vst [vmem:[#allocation13_spill] sm:$0xff] %v3948_v36  ;;  %v405_v49 = vsub.f32 %v3908_v45, %v4740_v39  ;;  %v3964_v8 = vsub.f32 %v2277_v19, %v3939_v17  ;;  %v3167_v28 = vpack.c.bf16 %v280_v51, %v273_v43  ;;  %v3967_v34 = vsub.f32 %v83_v24, %v3948_v36 }
  0x2e   :  { %4766 = vst [vmem:[#allocation14_spill] sm:$0xff] %v3952_v9  ;;  %3178 = vmatprep.subr.bf16.mxu0 %v3952_v9  ;;  %v4743_v62 = vand.u32 4294901760, %v3924_v53  ;;  %423 = vmatprep.mubr.f32.mxu1 %v3948_v36  ;;  %v3973_v29 = vsub.f32 %v57_v4, %v132_v12  ;;  %v399_v50 = vand.u32 4294901760, %v398_v3  ;;  %v286_v24 = vsub.f32 %v3913_v5, %v4742_v1 }
  0x2f   :  { %4767 = vst [vmem:[#allocation15_spill] sm:$0xff] %v3964_v8  ;;  %v406_v2 = vand.u32 4294901760, %v405_v49  ;;  %v4744_v39 = vand.u32 4294901760, %v3964_v8  ;;  %3168 = vmatpush3.bf16.msra.mxu1 %v3167_v28  ;;  %v184_v19 = vand.u32 4294901760, %v3967_v34  ;;  %v4751_v51 = vand.u32 4294901760, %v3929_v52 }
  0x30   :  { %v293_v43 = vsub.f32 %v3924_v53, %v4743_v62  ;;  %v4752_v4 = vand.u32 4294901760, %v3941_v40  ;;  %v287_v49 = vand.u32 4294901760, %v286_v24  ;;  %v3179_v24 = vpack.c.bf16 %v3660_v21, %v3650_v15 }
  0x31   :  { %v3984_v9 = vpack.c.bf16 %v406_v2, %v399_v50  ;;  %v191_v12 = vsub.f32 %v3964_v8, %v4744_v39  ;;  %v185_v3 = vsub.f32 %v3967_v34, %v184_v19  ;;  %v412_v1 = vsub.f32 %v3929_v52, %v4751_v51 }
  0x32   :  { %v294_v28 = vand.u32 4294901760, %v293_v43  ;;  %v419_v2 = vsub.f32 %v3941_v40, %v4752_v4  ;;  %v4753_v50 = vand.u32 4294901760, %v3955_v16  ;;  %v4754_v39 = vand.u32 4294901760, %v3973_v29 }
  0x33   :  { %3170 = vmatprep.subr.bf16.mxu1 %v3984_v9  ;;  %v192_v62 = vand.u32 4294901760, %v191_v12  ;;  %v186_v36 = vand.u32 4294901760, %v185_v3  ;;  %v413_v43 = vand.u32 4294901760, %v412_v1  ;;  %v4004_v51 = vpack.c.bf16 %v3673_v26, %v3671_v25 }
  0x34   :  { %v3171_v56 = vpack.c.bf16 %v294_v28, %v287_v49  ;;  %v420_v8 = vand.u32 4294901760, %v419_v2  ;;  %v300_v12 = vsub.f32 %v3955_v16, %v4753_v50  ;;  %v307_v4 = vsub.f32 %v3973_v29, %v4754_v39 }
  0x35   :  { %187 = vmatprep.mubr.f32.mxu0 %v186_v36  ;;  %v3183_v28 = vpack.c.bf16 %v3696_v41, %v3688_v37  ;;  %v4020_v50 = vpack.c.bf16 %v3725_v55, %v3698_v42  ;;  %v4768_v36 = vand.u32 4294901760, %v3678_v30  ;;  %v4775_v30 = vand.u32 4294901760, %v3696_v41 }
  0x36   :  { %3172 = vmatpush3.bf16.msra.mxu1 %v3171_v56  ;;  %193 = vmatmul.mubr.f32.vlgmr.msra.gmra.mrb[0].mxu0 %v192_v62  ;;  %v4012_v3 = vpack.c.bf16 %v420_v8, %v413_v43  ;;  %v301_v49 = vand.u32 4294901760, %v300_v12  ;;  %v308_v1 = vand.u32 4294901760, %v307_v4  ;;  %v3187_v56 = vpack.c.bf16 %v3752_v10, %v3727_v60 }
  0x37   :  { %3180 = vmatpush3.bf16.msra.mxu0 %v3179_v24  ;;  %560 = vmatprep.mubr.f32.mxu0 %v3967_v34  ;;  %v4769_v8 = vand.u32 4294901760, %v3680_v31  ;;  %v4770_v4 = vand.u32 4294901760, %v3650_v15  ;;  %v4771_v24 = vand.u32 4294901760, %v3660_v21  ;;  %v4772_v12 = vand.u32 4294901760, %v3671_v25 }
  0x38   :  { %3174 = vmatprep.subr.bf16.mxu1 %v4012_v3  ;;  %3182 = vmatprep.subr.bf16.mxu0 %v4004_v51  ;;  %v3175_v2 = vpack.c.bf16 %v308_v1, %v301_v49  ;;  %v4773_v49 = vand.u32 4294901760, %v3673_v26  ;;  %v4774_v34 = vand.u32 4294901760, %v3688_v37  ;;  %v4776_v31 = vand.u32 4294901760, %v3698_v42 }
  0x39   :  { %v4029_v62 = vpack.c.bf16 %v4769_v8, %v4768_v36  ;;  %v3243_v43 = vpack.c.bf16 %v4771_v24, %v4770_v4  ;;  %v4777_v36 = vand.u32 4294901760, %v3725_v55  ;;  %v4778_v21 = vand.u32 4294901760, %v3727_v60 }
  0x3a   :  { %v4039_v1 = vpack.c.bf16 %v4773_v49, %v4772_v12  ;;  %3176 = vmatpush3.bf16.msra.mxu1 %v3175_v2  ;;  %v3247_v39 = vpack.c.bf16 %v4775_v30, %v4774_v34  ;;  %v4779_v25 = vand.u32 4294901760, %v3752_v10  ;;  %v4780_v26 = vand.u32 4294901760, %v3754_v11 }
  0x3b   :  { %v4049_v15 = vpack.c.bf16 %v4777_v36, %v4776_v31  ;;  %v4781_v2 = vand.u32 4294901760, %v3773_v33  ;;  %3184 = vmatpush3.bf16.msra.mxu0 %v3183_v28  ;;  %3210 = vmatprep.subr.bf16.mxu1 %v3648_v14  ;;  %v4782_v37 = vand.u32 4294901760, %v3778_v47  ;;  %v4783_v41 = vand.u32 4294901760, %v3792_v57 }
  0x3c   :  { %v3251_v8 = vpack.c.bf16 %v4779_v25, %v4778_v21  ;;  %v4784_v55 = vand.u32 4294901760, %v3800_v63  ;;  %v4785_v60 = vand.u32 4294901760, %v3818_v48  ;;  %v4786_v24 = vand.u32 4294901760, %v3823_v58  ;;  %3186 = vmatprep.subr.bf16.mxu0 %v4020_v50 }
  0x3d   :  { %v4059_v4 = vpack.c.bf16 %v4781_v2, %v4780_v26  ;;  %v3255_v42 = vpack.c.bf16 %v4783_v41, %v4782_v37  ;;  %v4787_v12 = vand.u32 4294901760, %v3837_v54  ;;  %v4079_v28 = vpack.c.bf16 %v3773_v33, %v3754_v11  ;;  %425 = vmatmul.mubr.f32.vlgmr.msra.gmra.mrb[0].mxu1 %v3939_v17  ;;  %v4797_v26 = vld [vmem:[#allocation11_spill] sm:$0xff] }
  0x3e   :  { %v4070_v10 = vpack.c.bf16 %v4785_v60, %v4784_v55  ;;  %v4788_v34 = vand.u32 4294901760, %v3845_v18  ;;  %v4789_v30 = vand.u32 4294901760, %v3863_v32  ;;  %v4790_v36 = vand.u32 4294901760, %v3868_v35  ;;  %3212 = vmatpush3.bf16.msra.mxu1 %v3658_v20  ;;  %667 = vmatprep.mubr.f32.mxu1 %v184_v19  ;;  %v4811_v60 = vld [vmem:[#allocation9_spill] sm:$0xff] }
  0x3f   :  { %v3259_v49 = vpack.c.bf16 %v4787_v12, %v4786_v24  ;;  %v4791_v21 = vand.u32 4294901760, %v3882_v23  ;;  %3188 = vmatpush3.bf16.msra.mxu0 %v3187_v56  ;;  %3214 = vmatprep.subr.bf16.mxu1 %v3662_v22  ;;  %v3191_v11 = vpack.c.bf16 %v3792_v57, %v3778_v47  ;;  %v4099_v33 = vpack.c.bf16 %v3818_v48, %v3800_v63  ;;  %v4793_v48 = vld [vmem:[#allocation15_spill] sm:$0xff]  ;;  %v4812_v12 = vld [vmem:[#allocation12_spill] sm:$0xff] }
  0x40   :  { %v4085_v31 = vpack.c.bf16 %v4789_v30, %v4788_v34  ;;  %3190 = vmatprep.subr.bf16.mxu0 %v4079_v28  ;;  %v3195_v19 = vpack.c.bf16 %v3837_v54, %v3823_v58  ;;  %v4108_v56 = vpack.c.bf16 %v3863_v32, %v3845_v18  ;;  %v3199_v47 = vpack.c.bf16 %v3882_v23, %v3868_v35  ;;  %v4792_v18 = vld [vmem:[#allocation7_spill] sm:$0xff]  ;;  %v4794_v54 = vld [vmem:[#allocation8_spill] sm:$0xff]  ;;  %v4795_v32 = vld [vmem:[#allocation10_spill] sm:$0xff] }
  0x41   :  { %v3263_v25 = vpack.c.bf16 %v4791_v21, %v4790_v36  ;;  %v4117_v57 = vpack.c.bf16 %v3908_v45, %v3890_v0  ;;  %v3203_v58 = vpack.c.bf16 %v3924_v53, %v3913_v5  ;;  %v4126_v63 = vpack.c.bf16 %v3941_v40, %v3929_v52  ;;  %v4796_v23 = vld [vmem:[#allocation13_spill] sm:$0xff]  ;;  %v4813_v34 = vld [vmem:[#allocation14_spill] sm:$0xff] }
  0x42   :  { %3216 = vmatpush3.bf16.msra.mxu1 %v3675_v27  ;;  %v3207_v35 = vpack.c.bf16 %v3973_v29, %v3955_v16  ;;  %v4798_v2 = vand.u32 4294901760, %v4793_v48  ;;  %v4803_v37 = vand.u32 4294901760, %v3929_v52  ;;  %v2278_v52 = vld [vmem:[%s4700_s3 + $0x4] sm:$0x3]  ;;  %v4335_v36 = vld [vmem:[%s4698_s0 + $0x38] sm:$0xff] }
  0x43   :  { %3192 = vmatpush3.bf16.msra.mxu0 %v3191_v11  ;;  %3218 = vmatprep.subr.bf16.mxu1 %v3690_v38 }
  0x44   :  { %3194 = vmatprep.subr.bf16.mxu0 %v4099_v33 }
  0x46   :  { %3220 = vmatpush3.bf16.msra.mxu1 %v3701_v44 }
  0x47   :  { %3196 = vmatpush3.bf16.msra.mxu0 %v3195_v19  ;;  %3222 = vmatprep.subr.bf16.mxu1 %v3729_v61 }
  0x48   :  { %3198 = vmatprep.subr.bf16.mxu0 %v4108_v56 }
  0x4a   :  { %3224 = vmatpush3.bf16.msra.mxu1 %v3756_v13 }
  0x4b   :  { %3200 = vmatpush3.bf16.msra.mxu0 %v3199_v47  ;;  %3226 = vmatprep.subr.bf16.mxu1 %v3775_v46 }
  0x4c   :  { %3202 = vmatprep.subr.bf16.mxu0 %v4117_v57 }
  0x4e   :  { %3228 = vmatpush3.bf16.msra.mxu1 %v3802_v6 }
  0x4f   :  { %3204 = vmatpush3.bf16.msra.mxu0 %v3203_v58  ;;  %3230 = vmatprep.subr.bf16.mxu1 %v3820_v59 }
  0x50   :  { %3206 = vmatprep.subr.bf16.mxu0 %v4126_v63 }
  0x52   :  { %3232 = vmatpush3.bf16.msra.mxu1 %v3847_v7 }
  0x53   :  { %3208 = vmatpush3.bf16.msra.mxu0 %v3207_v35  ;;  %3234 = vmatprep.subr.bf16.mxu1 %v4792_v18  ;;  %v4367_v35 = vld [vmem:[%s4698_s0 + $0x40] sm:$0xff] }
  0x54   :  { %3242 = vmatprep.subr.bf16.mxu0 %v4029_v62 }
  0x56   :  { %563 = vmatmul.mubr.f32.vlgmr.msra.gmra.mrb[2].mxu0 %v4793_v48  ;;  %3236 = vmatpush3.bf16.msra.mxu1 %v4794_v54 }
  0x57   :  { %3244 = vmatpush3.bf16.msra.mxu0 %v3243_v43  ;;  %3238 = vmatprep.subr.bf16.mxu1 %v4795_v32 }
  0x58   :  { %3246 = vmatprep.subr.bf16.mxu0 %v4039_v1  ;;  %837 = vmatprep.mubr.f32.mxu0 %v4796_v23 }
  0x5a   :  { %3240 = vmatpush3.bf16.msra.mxu1 %v4797_v26 }
  0x5b   :  { %3248 = vmatpush3.bf16.msra.mxu0 %v3247_v39  ;;  %3274 = vmatprep.subr.bf16.mxu1 %v3648_v14  ;;  %v4800_v39 = vand.u32 4294901760, %v3908_v45 }
  0x5c   :  { %3250 = vmatprep.subr.bf16.mxu0 %v4049_v15 }
  0x5d   :  { %671 = vmatmul.mubr.f32.vlgmr.msra.gmra.mrb[2].mxu1 %v4798_v2 }
  0x5e   :  { %3276 = vmatpush3.bf16.msra.mxu1 %v3658_v20  ;;  %941 = vmatprep.mubr.f32.mxu1 %v4796_v23  ;;  %v4799_v20 = vand.u32 4294901760, %v3890_v0  ;;  %v4804_v0 = vand.u32 4294901760, %v3941_v40  ;;  %v4808_v40 = vld [vmem:[#allocation4_spill] sm:$0xff] }
  0x5f   :  { %3252 = vmatpush3.bf16.msra.mxu0 %v3251_v8  ;;  %3278 = vmatprep.subr.bf16.mxu1 %v3662_v22 }
  0x60   :  { %3254 = vmatprep.subr.bf16.mxu0 %v4059_v4  ;;  %v4160_v43 = vpack.c.bf16 %v4800_v39, %v4799_v20  ;;  %v4173_v41 = vpack.c.bf16 %v4804_v0, %v4803_v37  ;;  %v1649_v20 = vand.u32 4294901760, %v4367_v35  ;;  %v4404_v37 = vld [vmem:[%s4698_s0 + $0x50] sm:$0xff]  ;;  %v4409_v0 = vld [vmem:[%s4698_s0 + $0x58] sm:$0xff] }
  0x62   :  { %3280 = vmatpush3.bf16.msra.mxu1 %v3675_v27  ;;  %v4801_v27 = vand.u32 4294901760, %v3913_v5  ;;  %v4806_v5 = vand.u32 4294901760, %v3973_v29  ;;  %v4207_v29 = vand.u32 4294901760, %v2278_v52 }
  0x63   :  { %3256 = vmatpush3.bf16.msra.mxu0 %v3255_v42  ;;  %3282 = vmatprep.subr.bf16.mxu1 %v3690_v38  ;;  %v4810_v42 = vld [vmem:[#allocation6_spill] sm:$0xff] }
  0x64   :  { %3258 = vmatprep.subr.bf16.mxu0 %v4070_v10 }
  0x66   :  { %3284 = vmatpush3.bf16.msra.mxu1 %v3701_v44  ;;  %v4802_v44 = vand.u32 4294901760, %v3924_v53  ;;  %v3596_v53 = vmov 0.0|0.0  }
  0x67   :  { %3260 = vmatpush3.bf16.msra.mxu0 %v3259_v49  ;;  %3286 = vmatprep.subr.bf16.mxu1 %v3729_v61 }
  0x68   :  { %3262 = vmatprep.subr.bf16.mxu0 %v4085_v31  ;;  %v3267_v8 = vpack.c.bf16 %v4802_v44, %v4801_v27 }
  0x6a   :  { %3288 = vmatpush3.bf16.msra.mxu1 %v3756_v13  ;;  %v4805_v13 = vand.u32 4294901760, %v3955_v16  ;;  %v4214_v16 = vsub.f32 %v2278_v52, %v4207_v29 }
  0x6b   :  { %3264 = vmatpush3.bf16.msra.mxu0 %v3263_v25  ;;  %3290 = vmatprep.subr.bf16.mxu1 %v3775_v46 }
  0x6c   :  { %3266 = vmatprep.subr.bf16.mxu0 %v4160_v43  ;;  %v3271_v45 = vpack.c.bf16 %v4806_v5, %v4805_v13  ;;  %v1066_v55 = vand.u32 4294901760, %v4214_v16 }
  0x6e   :  { %3292 = vmatpush3.bf16.msra.mxu1 %v3802_v6  ;;  %v3598_v6 = vmov 0.0   ;;  %v1067_v24 = vsub.f32 %v4214_v16, %v1066_v55 }
  0x6f   :  { %3268 = vmatpush3.bf16.msra.mxu0 %v3267_v8  ;;  %3294 = vmatprep.subr.bf16.mxu1 %v3820_v59 }
  0x70   :  { %3270 = vmatprep.subr.bf16.mxu0 %v4173_v41  ;;  %v1068_v49 = vand.u32 4294901760, %v1067_v24  ;;  %v4446_v24 = vld [vmem:[%s4698_s0 + $0x60] sm:$0xff] }
  0x72   :  { %3296 = vmatpush3.bf16.msra.mxu1 %v3847_v7  ;;  %v4807_v7 = vld [vmem:[#allocation3_spill] sm:$0xff] }
  0x73   :  { %3272 = vmatpush3.bf16.msra.mxu0 %v3271_v45  ;;  %3298 = vmatprep.subr.bf16.mxu1 %v4792_v18 }
  0x74   :  { %3305 = vmatprep.subr.bf16.mxu0 %v3596_v53 }
  0x76   :  { %839 = vmatmul.mubr.f32.vlgmr.msra.gmra.mrb[4].mxu0 %v3939_v17  ;;  %3300 = vmatpush3.bf16.msra.mxu1 %v4794_v54 }
  0x77   :  { %3307 = vmatpush3.bf16.msra.mxu0 %v3648_v14  ;;  %3302 = vmatprep.subr.bf16.mxu1 %v4795_v32 }
  0x78   :  { %3308 = vmatprep.subr.bf16.mxu0 %v3596_v53  ;;  %2725 = vmatprep.mubr.msk.f32.mxu0 %vm3597_vm0, %v3598_v6 }
  0x7a   :  { %3304 = vmatpush3.bf16.msra.mxu1 %v4797_v26 }
  0x7b   :  { %3310 = vmatpush3.bf16.msra.mxu0 %v3662_v22  ;;  %3329 = vmatprep.subr.bf16.mxu1 %v3596_v53 }
  0x7c   :  { %3311 = vmatprep.subr.bf16.mxu0 %v3596_v53 }
  0x7d   :  { %943 = vmatmul.mubr.f32.vlgmr.msra.gmra.mrb[4].mxu1 %v3939_v17  ;;  %v4809_v17 = vld [vmem:[#allocation5_spill] sm:$0xff] }
  0x7e   :  { %3331 = vmatpush3.bf16.msra.mxu1 %v4807_v7  ;;  %2760 = vmatprep.mubr.msk.f32.mxu1 %vm3597_vm0, %v3598_v6  ;;  %v4429_v7 = vsub.f32 %v4367_v35, %v1649_v20 }
  0x7f   :  { %3313 = vmatpush3.bf16.msra.mxu0 %v3690_v38  ;;  %3332 = vmatprep.subr.bf16.mxu1 %v3596_v53 }
  0x80   :  { %3314 = vmatprep.subr.bf16.mxu0 %v3596_v53 }
  0x82   :  { %3334 = vmatpush3.bf16.msra.mxu1 %v4808_v40  ;;  %v1655_v40 = vand.u32 4294901760, %v4404_v37 }
  0x83   :  { %3316 = vmatpush3.bf16.msra.mxu0 %v3729_v61  ;;  %3335 = vmatprep.subr.bf16.mxu1 %v3596_v53 }
  0x84   :  { %3317 = vmatprep.subr.bf16.mxu0 %v3596_v53 }
  0x86   :  { %3337 = vmatpush3.bf16.msra.mxu1 %v4809_v17  ;;  %v1658_v17 = vand.u32 4294901760, %v4409_v0 }
  0x87   :  { %3319 = vmatpush3.bf16.msra.mxu0 %v3775_v46  ;;  %3338 = vmatprep.subr.bf16.mxu1 %v3596_v53 }
  0x88   :  { %3320 = vmatprep.subr.bf16.mxu0 %v3596_v53 }
  0x8a   :  { %3340 = vmatpush3.bf16.msra.mxu1 %v4810_v42 }
  0x8b   :  { %3322 = vmatpush3.bf16.msra.mxu0 %v3820_v59  ;;  %3341 = vmatprep.subr.bf16.mxu1 %v3596_v53 }
  0x8c   :  { %3323 = vmatprep.subr.bf16.mxu0 %v3596_v53 }
  0x8e   :  { %3343 = vmatpush3.bf16.msra.mxu1 %v4811_v60 }
  0x8f   :  { %3325 = vmatpush3.bf16.msra.mxu0 %v4792_v18  ;;  %3344 = vmatprep.subr.bf16.mxu1 %v3596_v53 }
  0x90   :  { %3326 = vmatprep.subr.bf16.mxu0 %v3596_v53 }
  0x92   :  { %3346 = vmatpush3.bf16.msra.mxu1 %v4812_v12  ;;  %v4451_v12 = vld [vmem:[%s4698_s0 + $0x68] sm:$0xff] }
  0x93   :  { %3328 = vmatpush3.bf16.msra.mxu0 %v4795_v32  ;;  %3347 = vmatprep.subr.bf16.mxu1 %v3596_v53 }
  0x94   :  { %3353 = vmatprep.subr.bf16.mxu0 %v3596_v53 }
  0x96   :  { %2726 = vmatmul.mubr.f32.vlgmr.msra.gmra.mrb[6].mxu0 %v1068_v49  ;;  %3349 = vmatpush3.bf16.msra.mxu1 %v3984_v9  ;;  %v950_v9 = vld [vmem:[%s4698_s0] sm:$0xff] }
  0x97   :  { %3355 = vmatpush3.bf16.msra.mxu0 %v4813_v34  ;;  %3350 = vmatprep.subr.bf16.mxu1 %v3596_v53 }
  0x98   :  { %3356 = vmatprep.subr.bf16.mxu0 %v3596_v53  ;;  %2795 = vmatprep.mubr.msk.f32.mxu0 %vm3597_vm0, %v3598_v6 }
  0x9a   :  { %3352 = vmatpush3.bf16.msra.mxu1 %v4012_v3  ;;  %v953_v3 = vld [vmem:[%s4698_s0 + $0x18] sm:$0xff] }
  0x9b   :  { %3358 = vmatpush3.bf16.msra.mxu0 %v4004_v51  ;;  %3377 = vmatprep.subr.bf16.mxu1 %v3596_v53  ;;  %v1625_v51 = vand.u32 4294901760, %v950_v9 }
  0x9c   :  { %3359 = vmatprep.subr.bf16.mxu0 %v3596_v53 }
  0x9d   :  { %2761 = vmatmul.mubr.f32.vlgmr.msra.gmra.mrb[6].mxu1 %v4207_v29 }
  0x9e   :  { %3379 = vmatpush3.bf16.msra.mxu1 %v3648_v14  ;;  %2830 = vmatprep.mubr.msk.f32.mxu1 %vm3597_vm0, %v3598_v6 }
  0x9f   :  { %3361 = vmatpush3.bf16.msra.mxu0 %v4020_v50  ;;  %3380 = vmatprep.subr.bf16.mxu1 %v3596_v53 }
  0xa0   :  { %3362 = vmatprep.subr.bf16.mxu0 %v3596_v53 }
  0xa2   :  { %3382 = vmatpush3.bf16.msra.mxu1 %v3662_v22 }
  0xa3   :  { %3364 = vmatpush3.bf16.msra.mxu0 %v4079_v28  ;;  %3383 = vmatprep.subr.bf16.mxu1 %v3596_v53 }
  0xa4   :  { %3365 = vmatprep.subr.bf16.mxu0 %v3596_v53 }
  0xa6   :  { %3385 = vmatpush3.bf16.msra.mxu1 %v3690_v38 }
  0xa7   :  { %3367 = vmatpush3.bf16.msra.mxu0 %v4099_v33  ;;  %3386 = vmatprep.subr.bf16.mxu1 %v3596_v53 }
  0xa8   :  { %3368 = vmatprep.subr.bf16.mxu0 %v3596_v53 }
  0xaa   :  { %3388 = vmatpush3.bf16.msra.mxu1 %v3729_v61 }
  0xab   :  { %3370 = vmatpush3.bf16.msra.mxu0 %v4108_v56  ;;  %3389 = vmatprep.subr.bf16.mxu1 %v3596_v53  ;;  %v1646_v56 = vand.u32 4294901760, %v4335_v36 }
  0xac   :  { %3371 = vmatprep.subr.bf16.mxu0 %v3596_v53 }
  0xad   :  { %v4387_v23 = vsub.f32 %v4335_v36, %v1646_v56 }
  0xae   :  { %3391 = vmatpush3.bf16.msra.mxu1 %v3775_v46 }
  0xaf   :  { %3373 = vmatpush3.bf16.msra.mxu0 %v4117_v57  ;;  %3392 = vmatprep.subr.bf16.mxu1 %v3596_v53  ;;  %v1767_v45 = vand.u32 4294901760, %v4387_v23 }
  0xb0   :  { %3374 = vmatprep.subr.bf16.mxu0 %v3596_v53 }
  0xb2   :  { %3394 = vmatpush3.bf16.msra.mxu1 %v3820_v59 }
  0xb3   :  { %3376 = vmatpush3.bf16.msra.mxu0 %v4126_v63  ;;  %3395 = vmatprep.subr.bf16.mxu1 %v3596_v53 }
  0xb4   :  { %3401 = vmatprep.subr.bf16.mxu0 %v3596_v53 }
  0xb6   :  { %2796 = vmatmul.mubr.f32.vlgmr.msra.gmra.mrb[8].mxu0 %v4214_v16  ;;  %3397 = vmatpush3.bf16.msra.mxu1 %v4792_v18 }
  0xb7   :  { %3403 = vmatpush3.bf16.msra.mxu0 %v4029_v62  ;;  %3398 = vmatprep.subr.bf16.mxu1 %v3596_v53  ;;  %v4315_v62 = vld [vmem:[%s4698_s0 + $0x28] sm:$0xff] }
  0xb8   :  { %3404 = vmatprep.subr.bf16.mxu0 %v3596_v53  ;;  %2865 = vmatprep.mubr.msk.f32.mxu0 %vm3597_vm0, %v3598_v6  ;;  %v1640_v30 = vand.u32 4294901760, %v4315_v62 }
  0xba   :  { %3400 = vmatpush3.bf16.msra.mxu1 %v4795_v32  ;;  %v4351_v19 = vsub.f32 %v4315_v62, %v1640_v30  ;;  %v1661_v62 = vand.u32 4294901760, %v4446_v24 }
  0xbb   :  { %3406 = vmatpush3.bf16.msra.mxu0 %v4039_v1  ;;  %3425 = vmatprep.subr.bf16.mxu1 %v3596_v53  ;;  %v4318_v1 = vsub.f32 %v950_v9, %v1625_v51  ;;  %v1768_v9 = vsub.f32 %v4387_v23, %v1767_v45 }
  0xbc   :  { %3407 = vmatprep.subr.bf16.mxu0 %v3596_v53  ;;  %v1753_v2 = vand.u32 4294901760, %v4351_v19 }
  0xbd   :  { %2831 = vmatmul.mubr.f32.vlgmr.msra.gmra.mrb[8].mxu1 %v1066_v55  ;;  %v1718_v25 = vand.u32 4294901760, %v4318_v1 }
  0xbe   :  { %3427 = vmatpush3.bf16.msra.mxu1 %v3648_v14  ;;  %2900 = vmatprep.mubr.msk.f32.mxu1 %vm3597_vm0, %v3598_v6  ;;  %v951_v14 = vld [vmem:[%s4698_s0 + $0x8] sm:$0xff]  ;;  %v1754_v13 = vsub.f32 %v4351_v19, %v1753_v2 }
  0xbf   :  { %3409 = vmatpush3.bf16.msra.mxu0 %v4049_v15  ;;  %3428 = vmatprep.subr.bf16.mxu1 %v3596_v53  ;;  %v1628_v50 = vand.u32 4294901760, %v951_v14  ;;  %v1719_v47 = vsub.f32 %v4318_v1, %v1718_v25 }
  0xc0   :  { %3410 = vmatprep.subr.bf16.mxu0 %v3596_v53  ;;  %v1755_v49 = vand.u32 4294901760, %v1754_v13 }
  0xc1   :  { %v4320_v15 = vsub.f32 %v951_v14, %v1628_v50  ;;  %v4376_v48 = vpack.c.bf16 %v1628_v50, %v1625_v51  ;;  %v949_v14 = vld [vmem:[%s4699_s2 + $0x2] sm:$0x3]  ;;  %v4467_v51 = vsub.f32 %v4404_v37, %v1655_v40  ;;  %v4470_v50 = vsub.f32 %v4409_v0, %v1658_v17 }
  0xc2   :  { %3430 = vmatpush3.bf16.msra.mxu1 %v3662_v22  ;;  %v952_v22 = vld [vmem:[%s4698_s0 + $0x10] sm:$0xff] }
  0xc3   :  { %3412 = vmatpush3.bf16.msra.mxu0 %v4059_v4  ;;  %3431 = vmatprep.subr.bf16.mxu1 %v3596_v53  ;;  %v1631_v4 = vand.u32 4294901760, %v952_v22  ;;  %v1725_v11 = vand.u32 4294901760, %v4320_v15 }
  0xc4   :  { %3413 = vmatprep.subr.bf16.mxu0 %v3596_v53 }
  0xc5   :  { %v1726_v57 = vsub.f32 %v4320_v15, %v1725_v11 }
  0xc6   :  { %3433 = vmatpush3.bf16.msra.mxu1 %v3690_v38  ;;  %v4310_v38 = vld [vmem:[%s4698_s0 + $0x20] sm:$0xff] }
  0xc7   :  { %3415 = vmatpush3.bf16.msra.mxu0 %v4070_v10  ;;  %3434 = vmatprep.subr.bf16.mxu1 %v3596_v53  ;;  %v1634_v10 = vand.u32 4294901760, %v953_v3  ;;  %v1637_v28 = vand.u32 4294901760, %v4310_v38  ;;  %v1727_v27 = vand.u32 4294901760, %v1726_v57 }
  0xc8   :  { %3416 = vmatprep.subr.bf16.mxu0 %v3596_v53 }
  0xc9   :  { %v4340_v21 = vsub.f32 %v953_v3, %v1634_v10  ;;  %v4348_v33 = vsub.f32 %v4310_v38, %v1637_v28  ;;  %v4441_v60 = vpack.c.bf16 %v1640_v30, %v1637_v28  ;;  %v965_v28 = vld [vmem:[%s4698_s0 + $0x78] sm:$0xff]  ;;  %v4492_v30 = vand.u32 4294901760, %v949_v14 }
  0xca   :  { %3436 = vmatpush3.bf16.msra.mxu1 %v3729_v61  ;;  %v4330_v61 = vld [vmem:[%s4698_s0 + $0x30] sm:$0xff]  ;;  %v1670_v0 = vand.u32 4294901760, %v965_v28 }
  0xcb   :  { %3418 = vmatpush3.bf16.msra.mxu0 %v4085_v31  ;;  %3437 = vmatprep.subr.bf16.mxu1 %v3596_v53  ;;  %v4338_v31 = vsub.f32 %v952_v22, %v1631_v4  ;;  %v1739_v63 = vand.u32 4294901760, %v4340_v21  ;;  %v1746_v26 = vand.u32 4294901760, %v4348_v33  ;;  %v1774_v22 = vand.u32 4294901760, %v4429_v7 }
  0xcc   :  { %3419 = vmatprep.subr.bf16.mxu0 %v3596_v53  ;;  %v4518_v13 = vsub.f32 %v949_v14, %v4492_v30 }
  0xcd   :  { %v1732_v58 = vand.u32 4294901760, %v4338_v31  ;;  %v1740_v8 = vsub.f32 %v4340_v21, %v1739_v63 }
  0xce   :  { %3439 = vmatpush3.bf16.msra.mxu1 %v3775_v46  ;;  %v1643_v46 = vand.u32 4294901760, %v4330_v61  ;;  %v1707_v14 = vand.u32 4294901760, %v4518_v13 }
  0xcf   :  { %3421 = vmatpush3.bf16.msra.mxu0 %v4160_v43  ;;  %3440 = vmatprep.subr.bf16.mxu1 %v3596_v53  ;;  %v1720_v43 = vand.u32 4294901760, %v1719_v47  ;;  %v1733_v44 = vsub.f32 %v4338_v31, %v1732_v58  ;;  %v1741_v55 = vand.u32 4294901760, %v1740_v8 }
  0xd0   :  { %3422 = vmatprep.subr.bf16.mxu0 %v3596_v53  ;;  %v4382_v54 = vsub.f32 %v4330_v61, %v1643_v46  ;;  %v1775_v61 = vsub.f32 %v4429_v7, %v1774_v22 }
  0xd1   :  { %v3474_v16 = vpack.c.bf16 %v1727_v27, %v1720_v43  ;;  %v1734_v42 = vand.u32 4294901760, %v1733_v44  ;;  %v1769_v43 = vand.u32 4294901760, %v1768_v9  ;;  %v4504_v27 = vsub.f32 %v4446_v24, %v1661_v62 }
  0xd2   :  { %3442 = vmatpush3.bf16.msra.mxu1 %v3820_v59  ;;  %v4372_v59 = vld [vmem:[%s4698_s0 + $0x48] sm:$0xff]  ;;  %v1760_v5 = vand.u32 4294901760, %v4382_v54 }
  0xd3   :  { %3424 = vmatpush3.bf16.msra.mxu0 %v4173_v41  ;;  %3443 = vmatprep.subr.bf16.mxu1 %v3596_v53  ;;  %v1652_v39 = vand.u32 4294901760, %v4372_v59  ;;  %v1747_v41 = vsub.f32 %v4348_v33, %v1746_v26  ;;  %v3477_v38 = vpack.c.bf16 %v1741_v55, %v1734_v42  ;;  %v1776_v42 = vand.u32 4294901760, %v1775_v61 }
  0xd4   :  { %3449 = vmatprep.subr.bf16.mxu0 %v3596_v53  ;;  %v1761_v34 = vsub.f32 %v4382_v54, %v1760_v5 }
  0xd5   :  { %v4434_v52 = vsub.f32 %v4372_v59, %v1652_v39 }
  0xd6   :  { %2866 = vmatmul.mubr.f32.vlgmr.msra.gmra.mrb[10].mxu0 %v4207_v29  ;;  %3445 = vmatpush3.bf16.msra.mxu1 %v4792_v18  ;;  %v4413_v18 = vpack.c.bf16 %v1634_v10, %v1631_v4  ;;  %v1664_v4 = vand.u32 4294901760, %v4451_v12  ;;  %v964_v10 = vld [vmem:[%s4698_s0 + $0x70] sm:$0xff]  ;;  %v1762_v57 = vand.u32 4294901760, %v1761_v34 }
  0xd7   :  { %3451 = vmatpush3.bf16.msra.mxu0 %v4376_v48  ;;  %3446 = vmatprep.subr.bf16.mxu1 %v3596_v53  ;;  %v1781_v3 = vand.u32 4294901760, %v4434_v52  ;;  %v1667_v8 = vand.u32 4294901760, %v964_v10 }
  0xd8   :  { %3452 = vmatprep.subr.bf16.mxu0 %v3596_v53  ;;  %2935 = vmatprep.mubr.msk.f32.mxu0 %vm3597_vm0, %v3598_v6  ;;  %v4507_v44 = vsub.f32 %v4451_v12, %v1664_v4 }
  0xd9   :  { %v1782_v36 = vsub.f32 %v4434_v52, %v1781_v3  ;;  %v4527_v59 = vsub.f32 %v964_v10, %v1667_v8 }
  0xda   :  { %3448 = vmatpush3.bf16.msra.mxu1 %v4795_v32  ;;  %v1748_v32 = vand.u32 4294901760, %v1747_v41  ;;  %v4515_v41 = vpack.c.bf16 %v1652_v39, %v1649_v20  ;;  %v4529_v20 = vsub.f32 %v965_v28, %v1670_v0  ;;  %v1802_v39 = vand.u32 4294901760, %v4504_v27 }
  0xdb   :  { %3454 = vmatpush3.bf16.msra.mxu0 %v4413_v18  ;;  %3473 = vmatprep.subr.bf16.mxu1 %v3596_v53  ;;  %v1783_v55 = vand.u32 4294901760, %v1782_v36  ;;  %v1809_v12 = vand.u32 4294901760, %v4507_v44  ;;  %v1816_v37 = vand.u32 4294901760, %v4527_v59 }
  0xdc   :  { %3455 = vmatprep.subr.bf16.mxu0 %v3596_v53  ;;  %v3480_v47 = vpack.c.bf16 %v1755_v49, %v1748_v32  ;;  %v4537_v32 = vpack.c.bf16 %v1658_v17, %v1655_v40  ;;  %v1823_v40 = vand.u32 4294901760, %v4529_v20  ;;  %v4551_v17 = vpack.c.bf16 %v1664_v4, %v1661_v62 }
  0xdd   :  { %2901 = vmatmul.mubr.f32.vlgmr.msra.gmra.mrb[10].mxu1 %v4207_v29  ;;  %v4484_v29 = vpack.c.bf16 %v1646_v56, %v1643_v46  ;;  %v1788_v46 = vand.u32 4294901760, %v4467_v51  ;;  %v1795_v56 = vand.u32 4294901760, %v4470_v50  ;;  %v3486_v49 = vpack.c.bf16 %v1783_v55, %v1776_v42 }
  0xde   :  { %3475 = vmatpush3.bf16.msra.mxu1 %v3474_v16  ;;  %2970 = vmatprep.mubr.msk.f32.mxu1 %vm3597_vm0, %v3598_v6  ;;  %v3483_v16 = vpack.c.bf16 %v1769_v43, %v1762_v57  ;;  %v1810_v10 = vsub.f32 %v4507_v44, %v1809_v12  ;;  %v1817_v61 = vsub.f32 %v4527_v59, %v1816_v37 }
  0xdf   :  { %3457 = vmatpush3.bf16.msra.mxu0 %v4441_v60  ;;  %3476 = vmatprep.subr.bf16.mxu1 %v3596_v53  ;;  %v1789_v24 = vsub.f32 %v4467_v51, %v1788_v46  ;;  %v1796_v35 = vsub.f32 %v4470_v50, %v1795_v56  ;;  %v1824_v36 = vsub.f32 %v4529_v20, %v1823_v40 }
  0xe0   :  { %3458 = vmatprep.subr.bf16.mxu0 %v3596_v53  ;;  %v1811_v43 = vand.u32 4294901760, %v1810_v10  ;;  %v4565_v62 = vpack.c.bf16 %v1670_v0, %v1667_v8  ;;  %v1818_v42 = vand.u32 4294901760, %v1817_v61  ;;  %v3501_v0 = vpack.c.bf16 %v4340_v21, %v4338_v31 }
  0xe1   :  { %v1790_v34 = vand.u32 4294901760, %v1789_v24  ;;  %v1797_v9 = vand.u32 4294901760, %v1796_v35  ;;  %v1825_v55 = vand.u32 4294901760, %v1824_v36  ;;  %v3498_v24 = vpack.c.bf16 %v4320_v15, %v4318_v1 }
  0xe2   :  { %3478 = vmatpush3.bf16.msra.mxu1 %v3477_v38  ;;  %v1803_v38 = vsub.f32 %v4504_v27, %v1802_v39  ;;  %v3504_v35 = vpack.c.bf16 %v4351_v19, %v4348_v33  ;;  %v3552_v1 = vpack.c.bf16 %v1753_v2, %v1746_v26  ;;  %v3555_v15 = vpack.c.bf16 %v1767_v45, %v1760_v5 }
  0xe3   :  { %3460 = vmatpush3.bf16.msra.mxu0 %v4484_v29  ;;  %3479 = vmatprep.subr.bf16.mxu1 %v3596_v53  ;;  %v3489_v28 = vpack.c.bf16 %v1797_v9, %v1790_v34  ;;  %v3495_v8 = vpack.c.bf16 %v1825_v55, %v1818_v42  ;;  %v3510_v34 = vpack.c.bf16 %v4434_v52, %v4429_v7 }
  0xe4   :  { %3461 = vmatprep.subr.bf16.mxu0 %v3596_v53  ;;  %v1804_v57 = vand.u32 4294901760, %v1803_v38  ;;  %v3513_v9 = vpack.c.bf16 %v4470_v50, %v4467_v51  ;;  %v3546_v42 = vpack.c.bf16 %v1725_v11, %v1718_v25  ;;  %v3561_v31 = vpack.c.bf16 %v1795_v56, %v1788_v46 }
  0xe5   :  { %v3564_v33 = vpack.c.bf16 %v1809_v12, %v1802_v39 }
  0xe6   :  { %3481 = vmatpush3.bf16.msra.mxu1 %v3480_v47  ;;  %v1708_v47 = vsub.f32 %v4518_v13, %v1707_v14 }
  0xe7   :  { %3463 = vmatpush3.bf16.msra.mxu0 %v4515_v41  ;;  %3482 = vmatprep.subr.bf16.mxu1 %v3596_v53 }
  0xe8   :  { %3464 = vmatprep.subr.bf16.mxu0 %v3596_v53  ;;  %v1709_v4 = vand.u32 4294901760, %v1708_v47 }
  0xea   :  { %3484 = vmatpush3.bf16.msra.mxu1 %v3483_v16  ;;  %v3492_v16 = vpack.c.bf16 %v1811_v43, %v1804_v57  ;;  %v74_v57 = vstv %s4701_s1  ;;  %v3519_v43 = vpack.c.bf16 %v4529_v20, %v4527_v59 }
  0xeb   :  { %3466 = vmatpush3.bf16.msra.mxu0 %v4537_v32  ;;  %3485 = vmatprep.subr.bf16.mxu1 %v3596_v53 }
  0xec   :  { %3467 = vmatprep.subr.bf16.mxu0 %v3596_v53 }
  0xee   :  { %3487 = vmatpush3.bf16.msra.mxu1 %v3486_v49  ;;  %v3507_v49 = vpack.c.bf16 %v4387_v23, %v4382_v54 }
  0xef   :  { %3469 = vmatpush3.bf16.msra.mxu0 %v4551_v17  ;;  %3488 = vmatprep.subr.bf16.mxu1 %v3596_v53 }
  0xf0   :  { %3470 = vmatprep.subr.bf16.mxu0 %v3596_v53 }
  0xf2   :  { %3490 = vmatpush3.bf16.msra.mxu1 %v3489_v28  ;;  %v3516_v28 = vpack.c.bf16 %v4507_v44, %v4504_v27 }
  0xf3   :  { %3472 = vmatpush3.bf16.msra.mxu0 %v4565_v62  ;;  %3491 = vmatprep.subr.bf16.mxu1 %v3596_v53 }
  0xf4   :  { %3497 = vmatprep.subr.bf16.mxu0 %v3596_v53 }
  0xf6   :  { %2936 = vmatmul.mubr.f32.vlgmr.msra.gmra.mrb[12].mxu0 %v1709_v4  ;;  %3493 = vmatpush3.bf16.msra.mxu1 %v3492_v16 }
  0xf7   :  { %3499 = vmatpush3.bf16.msra.mxu0 %v3498_v24  ;;  %3494 = vmatprep.subr.bf16.mxu1 %v3596_v53  ;;  %v3549_v24 = vpack.c.bf16 %v1739_v63, %v1732_v58  ;;  %v3567_v58 = vpack.c.bf16 %v1823_v40, %v1816_v37 }
  0xf8   :  { %3500 = vmatprep.subr.bf16.mxu0 %v3596_v53  ;;  %3005 = vmatprep.mubr.msk.f32.mxu0 %vm3597_vm0, %v3598_v6 }
  0xfa   :  { %3496 = vmatpush3.bf16.msra.mxu1 %v3495_v8 }
  0xfb   :  { %3502 = vmatpush3.bf16.msra.mxu0 %v3501_v0  ;;  %3521 = vmatprep.subr.bf16.mxu1 %v3596_v53 }
  0xfc   :  { %3503 = vmatprep.subr.bf16.mxu0 %v3596_v53 }
  0xfd   :  { %2971 = vmatmul.mubr.f32.vlgmr.msra.gmra.mrb[12].mxu1 %v4492_v30 }
  0xfe   :  { %3523 = vmatpush3.bf16.msra.mxu1 %v4376_v48  ;;  %3040 = vmatprep.mubr.msk.f32.mxu1 %vm3597_vm0, %v3598_v6 }
  0xff   :  { %3505 = vmatpush3.bf16.msra.mxu0 %v3504_v35  ;;  %3524 = vmatprep.subr.bf16.mxu1 %v3596_v53 }
 0x100   :  { %3506 = vmatprep.subr.bf16.mxu0 %v3596_v53 }
 0x102   :  { %3526 = vmatpush3.bf16.msra.mxu1 %v4413_v18 }
 0x103   :  { %3508 = vmatpush3.bf16.msra.mxu0 %v3507_v49  ;;  %3527 = vmatprep.subr.bf16.mxu1 %v3596_v53 }
 0x104   :  { %3509 = vmatprep.subr.bf16.mxu0 %v3596_v53 }
 0x106   :  { %3529 = vmatpush3.bf16.msra.mxu1 %v4441_v60 }
 0x107   :  { %3511 = vmatpush3.bf16.msra.mxu0 %v3510_v34  ;;  %3530 = vmatprep.subr.bf16.mxu1 %v3596_v53 }
 0x108   :  { %3512 = vmatprep.subr.bf16.mxu0 %v3596_v53 }
 0x109   :  { %v2311_v38 = vpop.f32.mrb[0].mxu0 }
 0x10a   :  { %3532 = vmatpush3.bf16.msra.mxu1 %v4484_v29  ;;  %v2312_v10 = vpop.f32.mrb[1].mxu0 }
 0x10b   :  { %3514 = vmatpush3.bf16.msra.mxu0 %v3513_v9  ;;  %3533 = vmatprep.subr.bf16.mxu1 %v3596_v53  ;;  %v2313_v47 = vadd.f32 %v2312_v10, %v2311_v38 }
 0x10c   :  { %3515 = vmatprep.subr.bf16.mxu0 %v3596_v53 }
 0x10d   :  { %v195_v61 = vadd.f32 %v2313_v47, %v74_v57 }
 0x10e   :  { %3535 = vmatpush3.bf16.msra.mxu1 %v4515_v41 }
 0x10f   :  { %3517 = vmatpush3.bf16.msra.mxu0 %v3516_v28  ;;  %3536 = vmatprep.subr.bf16.mxu1 %v3596_v53 }
 0x110   :  { %v2346_v36 = vpop.f32.mrb[0].mxu1  ;;  %3518 = vmatprep.subr.bf16.mxu0 %v3596_v53 }
 0x111   :  { %v2347_v4 = vpop.f32.mrb[1].mxu1 }
 0x112   :  { %v2348_v16 = vadd.f32 %v2347_v4, %v2346_v36  ;;  %3538 = vmatpush3.bf16.msra.mxu1 %v4537_v32 }
 0x113   :  { %3520 = vmatpush3.bf16.msra.mxu0 %v3519_v43  ;;  %3539 = vmatprep.subr.bf16.mxu1 %v3596_v53 }
 0x114   :  { %v427_v55 = vadd.f32 %v2348_v16, %v195_v61  ;;  %3545 = vmatprep.subr.bf16.mxu0 %v3596_v53 }
 0x116   :  { %3006 = vmatmul.mubr.f32.vlgmr.msra.gmra.mrb[14].mxu0 %v4518_v13  ;;  %3541 = vmatpush3.bf16.msra.mxu1 %v4551_v17 }
 0x117   :  { %3547 = vmatpush3.bf16.msra.mxu0 %v3546_v42  ;;  %3542 = vmatprep.subr.bf16.mxu1 %v3596_v53 }
 0x118   :  { %3548 = vmatprep.subr.bf16.mxu0 %v3596_v53  ;;  %3075 = vmatprep.mubr.msk.f32.mxu0 %vm3597_vm0, %v3598_v6 }
 0x11a   :  { %3544 = vmatpush3.bf16.msra.mxu1 %v4565_v62 }
 0x11b   :  { %3550 = vmatpush3.bf16.msra.mxu0 %v3549_v24  ;;  %3569 = vmatprep.subr.bf16.mxu1 %v3596_v53 }
 0x11c   :  { %3551 = vmatprep.subr.bf16.mxu0 %v3596_v53 }
 0x11d   :  { %3041 = vmatmul.mubr.f32.vlgmr.msra.gmra.mrb[14].mxu1 %v1707_v14 }
 0x11e   :  { %3571 = vmatpush3.bf16.msra.mxu1 %v4376_v48  ;;  %3110 = vmatprep.mubr.msk.f32.mxu1 %vm3597_vm0, %v3598_v6  ;;  %v3558_v6 = vpack.c.bf16 %v1781_v3, %v1774_v22 }
 0x11f   :  { %3553 = vmatpush3.bf16.msra.mxu0 %v3552_v1  ;;  %3572 = vmatprep.subr.bf16.mxu1 %v3596_v53 }
 0x120   :  { %3554 = vmatprep.subr.bf16.mxu0 %v3596_v53 }
 0x122   :  { %3574 = vmatpush3.bf16.msra.mxu1 %v4413_v18 }
 0x123   :  { %3556 = vmatpush3.bf16.msra.mxu0 %v3555_v15  ;;  %3575 = vmatprep.subr.bf16.mxu1 %v3596_v53 }
 0x124   :  { %3557 = vmatprep.subr.bf16.mxu0 %v3596_v53 }
 0x126   :  { %3577 = vmatpush3.bf16.msra.mxu1 %v4441_v60 }
 0x127   :  { %3559 = vmatpush3.bf16.msra.mxu0 %v3558_v6  ;;  %3578 = vmatprep.subr.bf16.mxu1 %v3596_v53 }
 0x128   :  { %3560 = vmatprep.subr.bf16.mxu0 %v3596_v53 }
 0x129   :  { %v2381_v21 = vpop.f32.mrb[2].mxu0 }
 0x12a   :  { %v2382_v25 = vpop.f32.mrb[3].mxu0  ;;  %3580 = vmatpush3.bf16.msra.mxu1 %v4484_v29 }
 0x12b   :  { %v2383_v11 = vadd.f32 %v2382_v25, %v2381_v21  ;;  %3562 = vmatpush3.bf16.msra.mxu0 %v3561_v31  ;;  %3581 = vmatprep.subr.bf16.mxu1 %v3596_v53 }
 0x12c   :  { %3563 = vmatprep.subr.bf16.mxu0 %v3596_v53 }
 0x12d   :  { %v565_v19 = vadd.f32 %v2383_v11, %v427_v55 }
 0x12e   :  { %3583 = vmatpush3.bf16.msra.mxu1 %v4515_v41 }
 0x12f   :  { %3565 = vmatpush3.bf16.msra.mxu0 %v3564_v33  ;;  %3584 = vmatprep.subr.bf16.mxu1 %v3596_v53 }
 0x130   :  { %v2416_v63 = vpop.f32.mrb[2].mxu1  ;;  %3566 = vmatprep.subr.bf16.mxu0 %v3596_v53 }
 0x131   :  { %v2417_v48 = vpop.f32.mrb[3].mxu1 }
 0x132   :  { %v2418_v54 = vadd.f32 %v2417_v48, %v2416_v63  ;;  %3586 = vmatpush3.bf16.msra.mxu1 %v4537_v32 }
 0x133   :  { %3568 = vmatpush3.bf16.msra.mxu0 %v3567_v58  ;;  %3587 = vmatprep.subr.bf16.mxu1 %v3596_v53 }
 0x134   :  { %v673_v23 = vadd.f32 %v2418_v54, %v565_v19 }
 0x136   :  { %3076 = vmatmul.mubr.f32.vlgmr.msra.gmra.mrb[16].mxu0 %v4492_v30  ;;  %3589 = vmatpush3.bf16.msra.mxu1 %v4551_v17 }
 0x137   :  { %3590 = vmatprep.subr.bf16.mxu1 %v3596_v53 }
 0x13a   :  { %3592 = vmatpush3.bf16.msra.mxu1 %v4565_v62 }
 0x13d   :  { %3111 = vmatmul.mubr.f32.vlgmr.msra.gmra.mrb[16].mxu1 %v4492_v30 }
 0x149   :  { %v2451_v26 = vpop.f32.mrb[4].mxu0 }
 0x14a   :  { %v2452_v2 = vpop.f32.mrb[5].mxu0 }
 0x14b   :  { %v2453_v18 = vadd.f32 %v2452_v2, %v2451_v26 }
 0x14d   :  { %v841_v5 = vadd.f32 %v2453_v18, %v673_v23 }
 0x150   :  { %v2486_v45 = vpop.f32.mrb[4].mxu1 }
 0x151   :  { %v2487_v7 = vpop.f32.mrb[5].mxu1 }
 0x152   :  { %v2488_v52 = vadd.f32 %v2487_v7, %v2486_v45 }
 0x154   :  { %v945_v60 = vadd.f32 %v2488_v52, %v841_v5 }
 0x156   :  { %948 = vst [vmem:[%s4702_s4] sm:$0x3] %v945_v60 }
 0x169   :  { %v1070_v51 = vpop.f32.mrb[6].mxu0 }
 0x16a   :  { %v2727_v50 = vpop.f32.mrb[7].mxu0 }
 0x170   :  { %v1221_v22 = vpop.f32.mrb[6].mxu1 }
 0x171   :  { %v1222_v53 = vadd.f32 %v1221_v22, %v1070_v51  ;;  %v2762_v3 = vpop.f32.mrb[7].mxu1 }
 0x189   :  { %v1325_v29 = vpop.f32.mrb[8].mxu0 }
 0x18a   :  { %v1326_v46 = vadd.f32 %v1325_v29, %v1222_v53  ;;  %v2797_v30 = vpop.f32.mrb[9].mxu0 }
 0x190   :  { %v1414_v56 = vpop.f32.mrb[8].mxu1 }
 0x191   :  { %v1415_v27 = vadd.f32 %v1414_v56, %v1326_v46  ;;  %v2832_v44 = vpop.f32.mrb[9].mxu1 }
 0x1a9   :  { %v1533_v41 = vpop.f32.mrb[10].mxu0 }
 0x1aa   :  { %v1534_v13 = vadd.f32 %v1533_v41, %v1415_v27  ;;  %v2867_v59 = vpop.f32.mrb[11].mxu0 }
 0x1b0   :  { %v1620_v20 = vpop.f32.mrb[10].mxu1 }
 0x1b1   :  { %v1621_v39 = vadd.f32 %v1620_v20, %v1534_v13  ;;  %v2902_v12 = vpop.f32.mrb[11].mxu1 }
 0x1c9   :  { %v1711_v32 = vpop.f32.mrb[12].mxu0 }
 0x1ca   :  { %v1712_v14 = vadd.f32 %v1711_v32, %v1621_v39  ;;  %v2937_v37 = vpop.f32.mrb[13].mxu0 }
 0x1d0   :  { %v1862_v40 = vpop.f32.mrb[12].mxu1 }
 0x1d1   :  { %v1863_v17 = vadd.f32 %v1862_v40, %v1712_v14  ;;  %v2972_v62 = vpop.f32.mrb[13].mxu1 }
 0x1e9   :  { %v1966_v8 = vpop.f32.mrb[14].mxu0 }
 0x1ea   :  { %v1967_v0 = vadd.f32 %v1966_v8, %v1863_v17  ;;  %v3007_v35 = vpop.f32.mrb[15].mxu0 }
 0x1f0   :  { %v2055_v49 = vpop.f32.mrb[14].mxu1 }
 0x1f1   :  { %v2056_v34 = vadd.f32 %v2055_v49, %v1967_v0  ;;  %v3042_v9 = vpop.f32.mrb[15].mxu1 }
 0x209   :  { %v2174_v38 = vpop.f32.mrb[16].mxu0 }
 0x20a   :  { %v2175_v10 = vadd.f32 %v2174_v38, %v2056_v34  ;;  %v3077_v28 = vpop.f32.mrb[17].mxu0 }
 0x210   :  { %v2261_v47 = vpop.f32.mrb[16].mxu1 }
 0x211   :  { %v2262_v43 = vadd.f32 %v2261_v47, %v2175_v10  ;;  %v3112_v61 = vpop.f32.mrb[17].mxu1 }
 0x213   :  { %v2265_v36 = vadd.f32 %v2262_v43, %v74_v57 }
 0x215   :  { %2266 = vst [vmem:[%s4702_s4 + $0x2] sm:$0x3] %v2265_v36 }

</bundles_post_ra>
